<compile_context>
chip_gen: v6e
topology: v6e:2x2x1
jax: 0.10.0
libtpu: 0.0.40
codegen_flags: <defaults>
</compile_context>

<pallas_src>
import functools

import jax
import jax.numpy as jnp
from jax.experimental import pallas as pl
from jax.experimental.pallas import tpu as pltpu


def _pair_indices(num_feature_field):
    row, col = [], []
    for i in range(num_feature_field - 1):
        for j in range(i + 1, num_feature_field):
            row.append(i)
            col.append(j)
    return row, col


def prepare_kernel_param(kernel_param, num_feature_field):
    """One-time (init-time) weight re-layout.

    kernel_param: [E_out, P, E_in]  (the PyTorch nn.Parameter)
    Returns:
      w_big: [F*E_in, P*E_out] block-sparse fused weight — rows of field f are
             nonzero only in the columns of pairs whose row-index is f, so the
             whole row-field contraction is a single matmul x @ w_big.
      seg  : [P*E_out, P] 0/1 block-diagonal segment-sum matrix (reduce e_out).
    """
    e_out, num_pairs, e_in = kernel_param.shape
    F = num_feature_field
    row, _ = _pair_indices(F)
    w_pair = jnp.transpose(kernel_param, (1, 2, 0))            # [P, E_in, E_out]
    w_big = jnp.zeros((F * e_in, num_pairs * e_out), kernel_param.dtype)
    for pr, f in enumerate(row):                               # init-time only
        w_big = w_big.at[f * e_in:(f + 1) * e_in,
                         pr * e_out:(pr + 1) * e_out].set(w_pair[pr])
    seg = (jnp.arange(num_pairs * e_out)[:, None] // e_out
           == jnp.arange(num_pairs)[None, :]).astype(jnp.float32)
    return w_big, seg


def _outer_product_kernel(x_ref, w_ref, seg_ref, o_ref, *, E, col):
    # x_ref  : [Bt, F*E]   flattened embeddings (field-major, e minor), bf16/f32
    # w_ref  : [F*E, P*E]  fused block-sparse weight, VMEM-resident across grid
    # seg_ref: [P*E, P]    0/1 segment-sum matrix, VMEM-resident across grid
    # o_ref  : [Bt, P]
    x = x_ref[...]

    # t[b, pr*E + eo] = sum_ei feat[b, row[pr], ei] * kernel[eo, pr, ei]
    # Single MXU push: K = F*E, N = P*E.  f32 accumulation.
    t = jnp.dot(x, w_ref[...], preferred_element_type=jnp.float32)   # [Bt, P*E]

    # q_full[b, pr*E + eo] = feat[b, col[pr], eo]  — static slices, one concat.
    q = jnp.concatenate([x[:, c * E:(c + 1) * E] for c in col], axis=1)

    # Elementwise product in f32 (v5e VPU has no bf16 ALUs), then one
    # segment-sum matmul over e_out groups and ONE store.
    prod = t * q.astype(jnp.float32)                                  # [Bt, P*E]
    o_ref[...] = jnp.dot(prod, seg_ref[...],
                         preferred_element_type=jnp.float32)          # [Bt, P]


def _pick_batch_tile(B):
    """Largest power-of-two tile <= B (floor 8, descending order), but keep the
    grid at >= 2 steps when possible so the "parallel" batch axis can split
    across both TensorCores on v7x.  Ragged B is handled by a cdiv grid with a
    masked tail tile (never a tiny-divisor fallback)."""
    for bt in (2048, 1024, 512, 256, 128, 64, 32, 16, 8):
        if bt <= B:
            return bt // 2 if (bt == B and bt >= 16) else bt
    return B  # B < 8: single full-batch tile (block == full array dim)


def outer_product_layer(feat_emb, w_big, seg, num_feature_field,
                        *, stream_dtype=jnp.bfloat16):
    """feat_emb: [B, F, E]; w_big/seg from prepare_kernel_param -> [B, P] f32."""
    B, F, E = feat_emb.shape
    assert F == num_feature_field
    P = F * (F - 1) // 2
    assert w_big.shape == (F * E, P * E)
    assert seg.shape == (P * E, P)
    _, col = _pair_indices(F)

    x2 = feat_emb.reshape(B, F * E)          # contiguous merge -> lane-dense
    if stream_dtype is not None and x2.dtype != stream_dtype:
        x2 = x2.astype(stream_dtype)         # halve HBM bytes; acc stays f32

    bt = _pick_batch_tile(B)
    grid = (pl.cdiv(B, bt),)                 # ragged tail handled by masking

    kernel = functools.partial(_outer_product_kernel, E=E, col=tuple(col))
    return pl.pallas_call(
        kernel,
        out_shape=jax.ShapeDtypeStruct((B, P), jnp.float32),
        grid=grid,
        in_specs=[
            pl.BlockSpec((bt, F * E), lambda b: (b, 0)),
            pl.BlockSpec((F * E, P * E), lambda b: (0, 0)),   # weight resident
            pl.BlockSpec((P * E, P), lambda b: (0, 0)),       # seg resident
        ],
        out_specs=pl.BlockSpec((bt, P), lambda b: (b, 0)),
        compiler_params=pltpu.CompilerParams(
            # batch axis sharded across TensorCores (v7x); near-no-op on v5e/v6e.
            dimension_semantics=("parallel",),
            # no vmem_limit_bytes: the kernel needs < 1.5 MiB, defaults suffice.
        ),
    )(x2, w_big, seg)


def _reference(feat_emb, kernel_param, num_feature_field):
    """Pure-JAX transcription of the PyTorch forward, for verification."""
    row, col = _pair_indices(num_feature_field)
    p = feat_emb[:, jnp.array(row)]            # [B, P, E]
    q = feat_emb[:, jnp.array(col)]            # [B, P, E]
    p = p[:, None]                             # [B, 1, P, E]
    p = p * kernel_param[None]                 # [B, E, P, E]
    p = jnp.sum(p, axis=-1)                    # [B, E, P]
    p = jnp.transpose(p, (0, 2, 1))            # [B, P, E]
    return jnp.sum(p * q, axis=-1)             # [B, P]


if __name__ == "__main__":
    key = jax.random.PRNGKey(0)
    B, F, E = 256, 4, 32
    P = F * (F - 1) // 2

    k_x, k_w = jax.random.split(key)
    feat_emb = jax.random.normal(k_x, (B, F, E), dtype=jnp.float32)

    # Deterministic xavier_uniform for a kernel of shape (E, P, E).
    fan_in, fan_out = P * E, E * E
    bound = (6.0 / (fan_in + fan_out)) ** 0.5
    kernel_param = jax.random.uniform(
        k_w, (E, P, E), minval=-bound, maxval=bound, dtype=jnp.float32
    )

    w_big, seg = prepare_kernel_param(kernel_param, F)   # init-time re-layout

    out = outer_product_layer(feat_emb, w_big, seg, F)
    out = jax.block_until_ready(out)

    # The kernel streams the input as bf16, so compare against the reference
    # evaluated on the same bf16-quantized input: this isolates kernel math
    # from the (intentional) input quantization.
    feat_q = feat_emb.astype(jnp.bfloat16).astype(jnp.float32)
    ref = _reference(feat_q, kernel_param, F)

    assert out.shape == (B, P), out.shape
    max_err = float(jnp.max(jnp.abs(out - ref)))
    assert max_err < 1e-2, max_err

    print("KERNEL_OK")
</pallas_src>

<mosaic_0001>
module attributes {stable_mosaic.version = 11 : i64} {
  func.func @_outer_product_kernel(%arg0: i32, %arg1: memref<128x128xbf16, #tpu.memory_space<vmem>>, %arg2: memref<128x192xf32, #tpu.memory_space<vmem>>, %arg3: memref<192x6xf32, #tpu.memory_space<vmem>>, %arg4: memref<128x6xf32, #tpu.memory_space<vmem>>) attributes {dimension_semantics = [#tpu.dimension_semantics<parallel>], iteration_bounds = array<i64: 2>, scalar_prefetch = 0 : i64, scratch_operands = 0 : i64, tpu.core_type = #tpu.core_type<tc>, window_params = [{transform_indices = @transform_0, window_bounds = array<i64: 128, 128>}, {pipeline_mode = #tpu.pipeline_mode<synchronous>, transform_indices = @transform_1, window_bounds = array<i64: 128, 192>}, {pipeline_mode = #tpu.pipeline_mode<synchronous>, transform_indices = @transform_2, window_bounds = array<i64: 192, 6>}, {transform_indices = @transform_3, window_bounds = array<i64: 128, 6>}]} {
    %c0 = arith.constant 0 : index
    %c0_0 = arith.constant 0 : index
    %0 = vector.load %arg1[%c0, %c0_0] : memref<128x128xbf16, #tpu.memory_space<vmem>>, vector<128x128xbf16>
    %c0_1 = arith.constant 0 : index
    %c0_2 = arith.constant 0 : index
    %1 = vector.load %arg2[%c0_1, %c0_2] : memref<128x192xf32, #tpu.memory_space<vmem>>, vector<128x192xf32>
    %cst = arith.constant dense<0.000000e+00> : vector<128x192xf32>
    %2 = tpu.matmul %0, %1, %cst {dimension_numbers = #tpu.dot_dimension_numbers<[1], [0], [0], [1], [0, 0, 1, 1], [], []>} : vector<128x128xbf16>, vector<128x192xf32>, vector<128x192xf32> -> vector<128x192xf32>
    %3 = vector.extract_strided_slice %0 {offsets = [0, 32], sizes = [128, 32], strides = [1, 1]} : vector<128x128xbf16> to vector<128x32xbf16>
    %4 = vector.extract_strided_slice %0 {offsets = [0, 64], sizes = [128, 32], strides = [1, 1]} : vector<128x128xbf16> to vector<128x32xbf16>
    %5 = vector.extract_strided_slice %0 {offsets = [0, 96], sizes = [128, 32], strides = [1, 1]} : vector<128x128xbf16> to vector<128x32xbf16>
    %6 = vector.extract_strided_slice %0 {offsets = [0, 64], sizes = [128, 32], strides = [1, 1]} : vector<128x128xbf16> to vector<128x32xbf16>
    %7 = vector.extract_strided_slice %0 {offsets = [0, 96], sizes = [128, 32], strides = [1, 1]} : vector<128x128xbf16> to vector<128x32xbf16>
    %8 = vector.extract_strided_slice %0 {offsets = [0, 96], sizes = [128, 32], strides = [1, 1]} : vector<128x128xbf16> to vector<128x32xbf16>
    %9 = tpu.concatenate %3, %4, %5, %6, %7, %8 in 1 : vector<128x32xbf16>, vector<128x32xbf16>, vector<128x32xbf16>, vector<128x32xbf16>, vector<128x32xbf16>, vector<128x32xbf16> -> vector<128x192xbf16>
    %10 = arith.extf %9 : vector<128x192xbf16> to vector<128x192xf32>
    %11 = arith.mulf %2, %10 : vector<128x192xf32>
    %c0_3 = arith.constant 0 : index
    %c0_4 = arith.constant 0 : index
    %12 = vector.load %arg3[%c0_3, %c0_4] : memref<192x6xf32, #tpu.memory_space<vmem>>, vector<192x6xf32>
    %cst_5 = arith.constant dense<0.000000e+00> : vector<128x6xf32>
    %13 = tpu.matmul %11, %12, %cst_5 {dimension_numbers = #tpu.dot_dimension_numbers<[1], [0], [0], [1], [0, 0, 1, 1], [], []>} : vector<128x192xf32>, vector<192x6xf32>, vector<128x6xf32> -> vector<128x6xf32>
    %c0_6 = arith.constant 0 : index
    %c0_7 = arith.constant 0 : index
    %14 = vector.load %arg4[%c0_6, %c0_7] : memref<128x6xf32, #tpu.memory_space<vmem>>, vector<128x6xf32>
    tpu.vector_store %arg4[%c0_6, %c0_7], %13 {strides = array<i32>} : memref<128x6xf32, #tpu.memory_space<vmem>>, vector<128x6xf32>,
    return
  }
  func.func @transform_0(%arg0: i32) -> (i32, i32) {
    %c0_i32 = arith.constant 0 : i32
    %c0_i32_0 = arith.constant 0 : i32
    return %arg0, %c0_i32 : i32, i32
  }
  func.func @transform_1(%arg0: i32) -> (i32, i32) {
    %c0_i32 = arith.constant 0 : i32
    %c0_i32_0 = arith.constant 0 : i32
    %c0_i32_1 = arith.constant 0 : i32
    return %c0_i32, %c0_i32_0 : i32, i32
  }
  func.func @transform_2(%arg0: i32) -> (i32, i32) {
    %c0_i32 = arith.constant 0 : i32
    %c0_i32_0 = arith.constant 0 : i32
    %c0_i32_1 = arith.constant 0 : i32
    return %c0_i32, %c0_i32_0 : i32, i32
  }
  func.func @transform_3(%arg0: i32) -> (i32, i32) {
    %c0_i32 = arith.constant 0 : i32
    %c0_i32_0 = arith.constant 0 : i32
    return %arg0, %c0_i32 : i32, i32
  }
}

</mosaic_0001>

<bundles_post_ra>
// kernel: tpu_custom_call.1
= control target key start
LH: loop header
LB: loop body
LE: loop exit
PB: predicated region body
PF: predicated region fallthrough
CT: control target
= control target key end

     0   :  { %s1022_s12 = smov 0   ;;  %s1435_s0 = inlined_call_operand.vmem [shape: bf16[256,128], index: 0, kind: input, shape index: {}]   ;;  %s1436_s1 = inlined_call_operand.vmem [shape: f32[128,192], index: 1, kind: input, shape index: {}]   ;;  %s1437_s2 = inlined_call_operand.vmem [shape: f32[192,6], index: 2, kind: input, shape index: {}]   ;;  %s1438_s3 = inlined_call_operand.vmem [shape: f32[256,6], index: 3, kind: output, shape index: {}]  }
   0x1 LB: > { %s885_s13 = sadd.s32 4294967295, %s995_s12   ;;  %p889_p0 = scmp.ge.s32.totalorder %s995_s12, 1  ;;  %s995_s12 = sphi %s1022_s12, %s13_s12  }
   0x2   : > { %p138_p1 = scmp.lt.s32.totalorder %s995_s12, 3 }
   0x4   : > { %p139_p2 = pnand %p889_p0, %p138_p1 }
   0x5   : > { %s890_s20 = sshll.u32 (!%p139_p2), %s885_s13, 4  ;;  %s999_s30 = smov (!%p139_p2), 32  }
   0x6   : > { %142 = sbr.rel (%p139_p2) target bundleno = 497 (0x1f1), region = 32  ;;  %p163_p3 = scmp.lt.s32.totalorder (!%p139_p2), %s890_s20, 31 }
   0x7   : > { %s1001_s11 = smov (!%p139_p2), 64  }
   0xb   : > { %v222_v0 = vld [vmem:[%s1436_s1 + $0xf8] sm:$0xff]  ;;  %v221_v1 = vld [vmem:[%s1436_s1 + $0xf0] sm:$0xff]  ;;  %v220_v2 = vld [vmem:[%s1436_s1 + $0xe8] sm:$0xff]  ;;  %v997_v4 = vmov 0   ;;  %s1440_s20 = smov (!%p163_p3, %s890_s20), 31  ;;  %v998_v10 = vmov 0.0  }
   0xc   : > { %271 = vmatprep.subr.mxu0 %v222_v0  ;;  %v219_v3 = vld [vmem:[%s1436_s1 + $0xe0] sm:$0xff]  ;;  %335 = vmatprep.mubr.bf16.mxu0 %v997_v4  ;;  %v218_v5 = vld [vmem:[%s1436_s1 + $0xd8] sm:$0xff]  ;;  %v217_v6 = vld [vmem:[%s1436_s1 + $0xd0] sm:$0xff]  ;;  %s891_s6 = sshll.u32 %s1440_s20, 2  ;;  %vm464_vm0 = vcmask 261120   ;;  %vm482_vm1 = vcmask 785408  }
   0xd   : > { %272 = vmatpush1.msra.mxu0 %v221_v1  ;;  %v216_v7 = vld [vmem:[%s1436_s1 + $0xc8] sm:$0xff]  ;;  %v215_v8 = vld [vmem:[%s1436_s1 + $0xc0] sm:$0xff]  ;;  %v214_v9 = vld [vmem:[%s1436_s1 + $0xb8] sm:$0xff]  ;;  %920 = vmatprep.subr.mxu1 %v998_v10  ;;  %s1077_s18 = scalar_lea.vmem %s1435_s0, %s891_s6  ;;  %s1000_s6 = smov 96   ;;  %vm473_vm2 = vcmask 523264   ;;  %vm812_vm3 = vcmask 48128  }
   0xe   : > { %273 = vmatprep.subr.mxu0 %v220_v2  ;;  %v213_v11 = vld [vmem:[%s1436_s1 + $0xb0] sm:$0xff]  ;;  %v212_v12 = vld [vmem:[%s1436_s1 + $0xa8] sm:$0xff]  ;;  %v211_v13 = vld [vmem:[%s1436_s1 + $0xa0] sm:$0xff]  ;;  %s893_s13 = sshll.u32 %s1440_s20, 3 }
   0xf   : > { %274 = vmatpush1.msra.mxu0 %v219_v3  ;;  %v210_v14 = vld [vmem:[%s1436_s1 + $0x98] sm:$0xff]  ;;  %v209_v15 = vld [vmem:[%s1436_s1 + $0x90] sm:$0xff]  ;;  %v208_v16 = vld [vmem:[%s1436_s1 + $0x88] sm:$0xff] }
  0x10   : > { %275 = vmatprep.subr.mxu0 %v218_v5  ;;  %v207_v17 = vld [vmem:[%s1436_s1 + $0x80] sm:$0xff]  ;;  %v1089_v18 = vld [vmem:[%s1077_s18 + $0x8] sm:$0xff]   ;;  %v206_v19 = vld [vmem:[%s1436_s1 + $0x78] sm:$0xff] }
  0x11   : > { %276 = vmatpush1.msra.mxu0 %v217_v6  ;;  %v205_v20 = vld [vmem:[%s1436_s1 + $0x70] sm:$0xff]  ;;  %434 = vrot.lane.b32.xlu0 %v1089_v18, %s999_s30  ;;  %v204_v21 = vld [vmem:[%s1436_s1 + $0x68] sm:$0xff]  ;;  %v203_v22 = vld [vmem:[%s1436_s1 + $0x60] sm:$0xff] }
  0x12   : > { %277 = vmatprep.subr.mxu0 %v216_v7  ;;  %418 = vrot.lane.b32.xlu1 %v1089_v18, %s1000_s6  ;;  %v1108_v23 = vld [vmem:[%s1077_s18 + $0x10] sm:$0xff]   ;;  %v202_v24 = vld [vmem:[%s1436_s1 + $0x58] sm:$0xff]  ;;  %v200_v27 = vld [vmem:[%s1436_s1 + $0x48] sm:$0xff] }
  0x13   : > { %278 = vmatpush1.msra.mxu0 %v215_v8  ;;  %v201_v25 = vld [vmem:[%s1436_s1 + $0x50] sm:$0xff]  ;;  %v610_v26 = vld [vmem:[%s1437_s2 + $0x78] sm:$0xff]  ;;  %v199_v28 = vld [vmem:[%s1436_s1 + $0x40] sm:$0xff] }
  0x14   : > { %279 = vmatprep.subr.mxu0 %v214_v9  ;;  %944 = vmatpush1.msra.mxu1 %v610_v26  ;;  %v198_v29 = vld [vmem:[%s1436_s1 + $0x38] sm:$0xff]  ;;  %v197_v30 = vld [vmem:[%s1436_s1 + $0x30] sm:$0xff]  ;;  %v196_v32 = vld [vmem:[%s1436_s1 + $0x28] sm:$0xff] }
  0x15   : > { %280 = vmatpush1.msra.mxu0 %v213_v11  ;;  %450 = vrot.lane.b32.xlu0 %v1089_v18, %s1001_s11  ;;  %v609_v31 = vld [vmem:[%s1437_s2 + $0x70] sm:$0xff]  ;;  %v1147_v33 = vld [vmem:[%s1077_s18 + $0x18] sm:$0xff]   ;;  %v195_v34 = vld [vmem:[%s1436_s1 + $0x20] sm:$0xff] }
  0x16   : > { %281 = vmatprep.subr.mxu0 %v212_v12  ;;  %436 = vrot.lane.b32.xlu1 %v1108_v23, %s999_s30  ;;  %v194_v35 = vld [vmem:[%s1436_s1 + $0x18] sm:$0xff]  ;;  %v193_v36 = vld [vmem:[%s1436_s1 + $0x10] sm:$0xff]  ;;  %v608_v37 = vld [vmem:[%s1437_s2 + $0x68] sm:$0xff] }
  0x17   : > { %282 = vmatpush1.msra.mxu0 %v211_v13  ;;  %921 = vmatprep.subr.mxu1 %v998_v10  ;;  %v192_v38 = vld [vmem:[%s1436_s1 + $0x8] sm:$0xff]  ;;  %v191_v39 = vld [vmem:[%s1436_s1] sm:$0xff]  ;;  %v606_v44 = vld [vmem:[%s1437_s2 + $0x58] sm:$0xff] }
  0x18   : > { %283 = vmatprep.subr.mxu0 %v210_v14  ;;  %945 = vmatpush1.msra.mxu1 %v609_v31  ;;  %v1173_v40 = vld [vmem:[%s1077_s18] sm:$0xff]   ;;  %v1194_v43 = vld [vmem:[%s1077_s18 + $0x28] sm:$0xff]   ;;  %v605_v45 = vld [vmem:[%s1437_s2 + $0x50] sm:$0xff] }
  0x19   : > { %284 = vmatpush1.msra.mxu0 %v209_v15  ;;  %452 = vrot.lane.b32.xlu0 %v1108_v23, %s1001_s11  ;;  %v1176_v41 = vld [vmem:[%s1077_s18 + $0x20] sm:$0xff]   ;;  %v1213_v46 = vld [vmem:[%s1077_s18 + $0x30] sm:$0xff]   ;;  %v604_v47 = vld [vmem:[%s1437_s2 + $0x48] sm:$0xff] }
  0x1a   : > { %285 = vmatprep.subr.mxu0 %v208_v16  ;;  %420 = vrot.lane.b32.xlu1 %v1108_v23, %s1000_s6  ;;  %v607_v42 = vld [vmem:[%s1437_s2 + $0x60] sm:$0xff]  ;;  %v1237_v49 = vld [vmem:[%s1077_s18 + $0x38] sm:$0xff]   ;;  %v601_v51 = vld [vmem:[%s1437_s2 + $0x30] sm:$0xff] }
  0x1b   : > { %286 = vmatpush1.msra.mxu0 %v207_v17  ;;  %922 = vmatprep.subr.mxu1 %v998_v10  ;;  %v603_v48 = vld [vmem:[%s1437_s2 + $0x40] sm:$0xff]  ;;  %v602_v50 = vld [vmem:[%s1437_s2 + $0x38] sm:$0xff]  ;;  %v600_v52 = vld [vmem:[%s1437_s2 + $0x28] sm:$0xff] }
  0x1c   : > { %287 = vmatprep.subr.mxu0 %v206_v19  ;;  %946 = vmatpush1.msra.mxu1 %v608_v37  ;;  %v599_v53 = vld [vmem:[%s1437_s2 + $0x20] sm:$0xff]  ;;  %v598_v54 = vld [vmem:[%s1437_s2 + $0x18] sm:$0xff]  ;;  %v597_v55 = vld [vmem:[%s1437_s2 + $0x10] sm:$0xff] }
  0x1d   : > { %288 = vmatpush1.msra.mxu0 %v205_v20  ;;  %438 = vrot.lane.b32.xlu0 %v1147_v33, %s999_s30  ;;  %v596_v56 = vld [vmem:[%s1437_s2 + $0x8] sm:$0xff]  ;;  %v595_v57 = vld [vmem:[%s1437_s2] sm:$0xff]  ;;  %v618_v58 = vld [vmem:[%s1437_s2 + $0xb8] sm:$0xff] }
  0x1e   : > { %289 = vmatprep.subr.mxu0 %v204_v21  ;;  %454 = vrot.lane.b32.xlu1 %v1147_v33, %s1001_s11  ;;  %v617_v59 = vld [vmem:[%s1437_s2 + $0xb0] sm:$0xff]  ;;  %v616_v60 = vld [vmem:[%s1437_s2 + $0xa8] sm:$0xff]  ;;  %v615_v61 = vld [vmem:[%s1437_s2 + $0xa0] sm:$0xff] }
  0x1f   : > { %290 = vmatpush1.msra.mxu0 %v203_v22  ;;  %923 = vmatprep.subr.mxu1 %v998_v10  ;;  %v614_v62 = vld [vmem:[%s1437_s2 + $0x98] sm:$0xff]  ;;  %v613_v63 = vld [vmem:[%s1437_s2 + $0x90] sm:$0xff]  ;;  %v612_v0 = vld [vmem:[%s1437_s2 + $0x88] sm:$0xff] }
  0x20   : > { %291 = vmatprep.subr.mxu0 %v202_v24  ;;  %947 = vmatpush1.msra.mxu1 %v607_v42  ;;  %v611_v1 = vld [vmem:[%s1437_s2 + $0x80] sm:$0xff] }
  0x21   : > { %292 = vmatpush1.msra.mxu0 %v201_v25  ;;  %422 = vrot.lane.b32.xlu0 %v1147_v33, %s1000_s6 }
  0x22   : > { %293 = vmatprep.subr.mxu0 %v200_v27  ;;  %440 = vrot.lane.b32.xlu1 %v1176_v41, %s999_s30 }
  0x23   : > { %294 = vmatpush1.msra.mxu0 %v199_v28  ;;  %924 = vmatprep.subr.mxu1 %v998_v10 }
  0x24   : > { %295 = vmatprep.subr.mxu0 %v198_v29  ;;  %948 = vmatpush1.msra.mxu1 %v606_v44 }
  0x25   : > { %296 = vmatpush1.msra.mxu0 %v197_v30  ;;  %456 = vrot.lane.b32.xlu0 %v1176_v41, %s1001_s11 }
  0x26   : > { %297 = vmatprep.subr.mxu0 %v196_v32  ;;  %424 = vrot.lane.b32.xlu1 %v1176_v41, %s1000_s6 }
  0x27   : > { %298 = vmatpush1.msra.mxu0 %v195_v34  ;;  %925 = vmatprep.subr.mxu1 %v998_v10 }
  0x28   : > { %299 = vmatprep.subr.mxu0 %v194_v35  ;;  %949 = vmatpush1.msra.mxu1 %v605_v45 }
  0x29   : > { %300 = vmatpush1.msra.mxu0 %v193_v36  ;;  %442 = vrot.lane.b32.xlu0 %v1194_v43, %s999_s30 }
  0x2a   : > { %301 = vmatprep.subr.mxu0 %v192_v38  ;;  %458 = vrot.lane.b32.xlu1 %v1194_v43, %s1001_s11 }
  0x2b   : > { %302 = vmatpush1.msra.mxu0 %v191_v39  ;;  %926 = vmatprep.subr.mxu1 %v998_v10 }
  0x2c   : > { %336 = vmatmul.mubr.bf16.vlgmr.msra.gmra.mxu0 %v1173_v40  ;;  %667 = vmatprep.subr.mxu0 %v998_v10 }
  0x2d   : > { %345 = vmatprep.mubr.bf16.mxu0 %v997_v4  ;;  %668 = vmatpush1.msra.mxu0 %v610_v26 }
  0x2e   : > { %669 = vmatprep.subr.mxu0 %v998_v10  ;;  %426 = vrot.lane.b32.xlu0 %v1194_v43, %s1000_s6 }
  0x2f   : > { %670 = vmatpush1.msra.mxu0 %v609_v31  ;;  %444 = vrot.lane.b32.xlu1 %v1213_v46, %s999_s30 }
  0x30   : > { %671 = vmatprep.subr.mxu0 %v998_v10  ;;  %950 = vmatpush1.msra.mxu1 %v604_v47 }
  0x31   : > { %672 = vmatpush1.msra.mxu0 %v608_v37  ;;  %927 = vmatprep.subr.mxu1 %v998_v10 }
  0x32   : > { %673 = vmatprep.subr.mxu0 %v998_v10  ;;  %460 = vrot.lane.b32.xlu0 %v1213_v46, %s1001_s11 }
  0x33   : > { %674 = vmatpush1.msra.mxu0 %v607_v42  ;;  %428 = vrot.lane.b32.xlu1 %v1213_v46, %s1000_s6 }
  0x34   : > { %346 = vmatmul.mubr.bf16.gmra.mxu0 %v1089_v18  ;;  %675 = vmatprep.subr.mxu0 %v998_v10 }
  0x35   : > { %355 = vmatprep.mubr.bf16.mxu0 %v997_v4  ;;  %676 = vmatpush1.msra.mxu0 %v606_v44 }
  0x36   : > { %677 = vmatprep.subr.mxu0 %v998_v10  ;;  %951 = vmatpush1.msra.mxu1 %v603_v48 }
  0x37   : > { %678 = vmatpush1.msra.mxu0 %v605_v45  ;;  %432 = vrot.lane.b32.xlu0 %v1173_v40, %s999_s30 }
  0x38   : > { %679 = vmatprep.subr.mxu0 %v998_v10  ;;  %446 = vrot.lane.b32.xlu1 %v1237_v49, %s999_s30 }
  0x39   : > { %680 = vmatpush1.msra.mxu0 %v604_v47  ;;  %928 = vmatprep.subr.mxu1 %v998_v10 }
  0x3a   : > { %681 = vmatprep.subr.mxu0 %v998_v10  ;;  %952 = vmatpush1.msra.mxu1 %v602_v50 }
  0x3b   : > { %682 = vmatpush1.msra.mxu0 %v603_v48  ;;  %448 = vrot.lane.b32.xlu0 %v1173_v40, %s1001_s11 }
  0x3c   : > { %356 = vmatmul.mubr.bf16.gmra.mxu0 %v1108_v23  ;;  %683 = vmatprep.subr.mxu0 %v998_v10 }
  0x3d   : > { %365 = vmatprep.mubr.bf16.mxu0 %v997_v4  ;;  %462 = vrot.lane.b32.xlu1 %v1237_v49, %s1001_s11 }
  0x3e   : > { %684 = vmatpush1.msra.mxu0 %v602_v50  ;;  %929 = vmatprep.subr.mxu1 %v998_v10 }
  0x3f   : > { %685 = vmatprep.subr.mxu0 %v998_v10  ;;  %953 = vmatpush1.msra.mxu1 %v601_v51 }
  0x40   : > { %416 = vrot.lane.b32.xlu0 %v1173_v40, %s1000_s6  ;;  %686 = vmatpush1.msra.mxu0 %v601_v51 }
  0x41   : > { %430 = vrot.lane.b32.xlu1 %v1237_v49, %s1000_s6  ;;  %687 = vmatprep.subr.mxu0 %v998_v10  ;;  %s1398_s6 = scalar_lea.vmem %s1438_s3, %s893_s13 }
  0x42   : > { %930 = vmatprep.subr.mxu1 %v998_v10  ;;  %688 = vmatpush1.msra.mxu0 %v600_v52 }
  0x43   : > { %954 = vmatpush1.msra.mxu1 %v600_v52  ;;  %689 = vmatprep.subr.mxu0 %v998_v10 }
  0x44   : > { %366 = vmatmul.mubr.bf16.gmra.mxu0 %v1147_v33  ;;  %931 = vmatprep.subr.mxu1 %v998_v10 }
  0x45   : > { %375 = vmatprep.mubr.bf16.mxu0 %v997_v4  ;;  %690 = vmatpush1.msra.mxu0 %v599_v53 }
  0x46   : > { %955 = vmatpush1.msra.mxu1 %v599_v53  ;;  %691 = vmatprep.subr.mxu0 %v998_v10 }
  0x47   : > { %932 = vmatprep.subr.mxu1 %v998_v10  ;;  %692 = vmatpush1.msra.mxu0 %v598_v54 }
  0x48   : > { %956 = vmatpush1.msra.mxu1 %v598_v54  ;;  %693 = vmatprep.subr.mxu0 %v998_v10 }
  0x49   : > { %933 = vmatprep.subr.mxu1 %v998_v10  ;;  %694 = vmatpush1.msra.mxu0 %v597_v55 }
  0x4a   : > { %957 = vmatpush1.msra.mxu1 %v597_v55  ;;  %695 = vmatprep.subr.mxu0 %v998_v10 }
  0x4b   : > { %934 = vmatprep.subr.mxu1 %v998_v10  ;;  %696 = vmatpush1.msra.mxu0 %v596_v56 }
  0x4c   : > { %376 = vmatmul.mubr.bf16.gmra.mxu0 %v1176_v41  ;;  %958 = vmatpush1.msra.mxu1 %v596_v56 }
  0x4d   : > { %385 = vmatprep.mubr.bf16.mxu0 %v997_v4  ;;  %697 = vmatprep.subr.mxu0 %v998_v10 }
  0x4e   : > { %935 = vmatprep.subr.mxu1 %v998_v10  ;;  %698 = vmatpush1.msra.mxu0 %v595_v57 }
  0x4f   : > { %959 = vmatpush1.msra.mxu1 %v595_v57  ;;  %715 = vmatprep.subr.mxu0 %v998_v10 }
  0x50   : > { %716 = vmatpush2.msra.mxu0 %v618_v58  ;;  %936 = vmatprep.subr.mxu1 %v998_v10 }
  0x51   : > { %717 = vmatprep.subr.mxu0 %v998_v10  ;;  %960 = vmatpush2.msra.mxu1 %v618_v58 }
  0x52   : > { %718 = vmatpush2.msra.mxu0 %v617_v59  ;;  %937 = vmatprep.subr.mxu1 %v998_v10 }
  0x53   : > { %719 = vmatprep.subr.mxu0 %v998_v10  ;;  %961 = vmatpush2.msra.mxu1 %v617_v59 }
  0x54   : > { %386 = vmatmul.mubr.bf16.gmra.mxu0 %v1194_v43  ;;  %938 = vmatprep.subr.mxu1 %v998_v10 }
  0x55   : > { %395 = vmatprep.mubr.bf16.mxu0 %v997_v4  ;;  %720 = vmatpush2.msra.mxu0 %v616_v60 }
  0x56   : > { %721 = vmatprep.subr.mxu0 %v998_v10  ;;  %962 = vmatpush2.msra.mxu1 %v616_v60 }
  0x57   : > { %722 = vmatpush2.msra.mxu0 %v615_v61  ;;  %939 = vmatprep.subr.mxu1 %v998_v10 }
  0x58   : > { %723 = vmatprep.subr.mxu0 %v998_v10  ;;  %963 = vmatpush2.msra.mxu1 %v615_v61 }
  0x59   : > { %724 = vmatpush2.msra.mxu0 %v614_v62  ;;  %940 = vmatprep.subr.mxu1 %v998_v10 }
  0x5a   : > { %725 = vmatprep.subr.mxu0 %v998_v10  ;;  %964 = vmatpush2.msra.mxu1 %v614_v62 }
  0x5b   : > { %941 = vmatprep.subr.mxu1 %v998_v10  ;;  %726 = vmatpush2.msra.mxu0 %v613_v63 }
  0x5c   : > { %396 = vmatmul.mubr.bf16.gmra.mxu0 %v1213_v46  ;;  %965 = vmatpush2.msra.mxu1 %v613_v63 }
  0x5d   : > { %405 = vmatprep.mubr.bf16.mxu0 %v997_v4  ;;  %727 = vmatprep.subr.mxu0 %v998_v10 }
  0x5e   : > { %942 = vmatprep.subr.mxu1 %v998_v10  ;;  %728 = vmatpush2.msra.mxu0 %v612_v0 }
  0x5f   : > { %966 = vmatpush2.msra.mxu1 %v612_v0  ;;  %729 = vmatprep.subr.mxu0 %v998_v10 }
  0x60   : > { %943 = vmatprep.subr.mxu1 %v998_v10  ;;  %730 = vmatpush2.msra.mxu0 %v611_v1 }
  0x61   : > { %967 = vmatpush2.msra.mxu1 %v611_v1 }
  0x64   : > { %406 = vmatmul.mubr.bf16.gmra.mxu0 %v1237_v49 }
  0x83   : > { %v435_v2 = vpop.permute.xlu0 %434 }
  0x84   : > { %v419_v13 = vpop.permute.xlu1 %418 }
  0x85   : > { %v487_v31 = vsel %vm482_vm1, %v419_v13, %v435_v2 }
  0x86   : > { %v535_v36 = vunpack.c.l.bf16 %v487_v31  ;;  %v537_v45 = vunpack.c.h.bf16 %v487_v31 }
  0x87   : > { %v451_v3 = vpop.permute.xlu0 %450 }
  0x88   : > { %v437_v14 = vpop.permute.xlu1 %436  ;;  %v511_v29 = vsel %vm464_vm0, %v435_v2, %v451_v3 }
  0x89   : > { %v536_v35 = vunpack.c.l.bf16 %v511_v29  ;;  %v538_v43 = vunpack.c.h.bf16 %v511_v29 }
  0x8b   : > { %v453_v4 = vpop.permute.xlu0 %452 }
  0x8c   : > { %v421_v18 = vpop.permute.xlu1 %420  ;;  %v514_v44 = vsel %vm464_vm0, %v437_v14, %v453_v4 }
  0x8d   : > { %v490_v42 = vsel %vm482_vm1, %v421_v18, %v437_v14  ;;  %v540_v52 = vunpack.c.l.bf16 %v514_v44  ;;  %v542_v58 = vunpack.c.h.bf16 %v514_v44 }
  0x8e   : > { %v539_v50 = vunpack.c.l.bf16 %v490_v42  ;;  %v541_v60 = vunpack.c.h.bf16 %v490_v42 }
  0x8f   : > { %v1342_v5 = vpop.permute.xlu0 %438 }
  0x90   : > { %v455_v28 = vpop.permute.xlu1 %454 }
  0x91   : > { %v517_v59 = vsel %vm464_vm0, %v1342_v5, %v455_v28 }
  0x92   : > { %v544_v3 = vunpack.c.l.bf16 %v517_v59 }
  0x93   : > { %v1344_v6 = vpop.permute.xlu0 %422 }
  0x94   : > { %v441_v38 = vpop.permute.xlu1 %440  ;;  %v493_v57 = vsel %vm482_vm1, %v1344_v6, %v1342_v5  ;;  %v546_v5 = vunpack.c.h.bf16 %v517_v59 }
  0x95   : > { %v543_v2 = vunpack.c.l.bf16 %v493_v57 }
  0x97   : > { %v1346_v7 = vpop.permute.xlu0 %456 }
  0x98   : > { %v425_v51 = vpop.permute.xlu1 %424 }
  0x99   : > { %v496_v14 = vsel %vm482_vm1, %v425_v51, %v441_v38 }
  0x9b   : > { %v1348_v8 = vpop.permute.xlu0 %442 }
  0x9c   : > { %v459_v62 = vpop.permute.xlu1 %458 }
  0x9d   : > { %v523_v29 = vsel %vm464_vm0, %v1348_v8, %v459_v62 }
  0xa0   : > { %v1350_v9 = vpop.permute.xlu0 %426 }
  0xa4   : > { %v1352_v11 = vpop.permute.xlu0 %460 }
  0xa9   : > { %v433_v12 = vpop.permute.xlu0 %432 }
  0xad   : > { %v449_v10 = vpop.permute.xlu0 %448 }
  0xae   : > { %v508_v16 = vsel %vm464_vm0, %v433_v12, %v449_v10  ;;  %v445_v10 = vpop.permute.xlu1 %444 }
  0xaf   : > { %v532_v19 = vunpack.c.l.bf16 %v508_v16  ;;  %v534_v24 = vunpack.c.h.bf16 %v508_v16  ;;  %v545_v16 = vunpack.c.h.bf16 %v493_v57 }
  0xb2   : > { %v417_v15 = vpop.permute.xlu0 %416 }
  0xb3   : > { %v484_v17 = vsel %vm482_vm1, %v417_v15, %v433_v12  ;;  %v520_v15 = vsel %vm464_vm0, %v441_v38, %v1346_v7  ;;  %v499_v7 = vsel %vm482_vm1, %v1350_v9, %v1348_v8  ;;  %v526_v8 = vsel %vm464_vm0, %v445_v10, %v1352_v11 }
  0xb4   : > { %v531_v21 = vunpack.c.l.bf16 %v484_v17  ;;  %v533_v27 = vunpack.c.h.bf16 %v484_v17  ;;  %v550_v28 = vunpack.c.h.bf16 %v520_v15  ;;  %v558_v11 = vunpack.c.h.bf16 %v526_v8 }
  0xec   : > { %v337_v20 = vpop.f32.mrf.mxu0 }
  0xed   : > { %v563_v25 = vmul.f32 %v531_v21, %v337_v20  ;;  %v547_v21 = vunpack.c.l.bf16 %v496_v14 }
  0xee   : > { %v339_v22 = vpop.f32.mrf.mxu0 }
  0xef   : > { %v564_v23 = vmul.f32 %v532_v19, %v339_v22  ;;  %v548_v22 = vunpack.c.l.bf16 %v520_v15 }
  0xf0   : > { %v341_v26 = vpop.f32.mrf.mxu0 }
  0xf1   : > { %902 = vmatprep.mubr.msk.f32.mxu0 %vm473_vm2, %v564_v23  ;;  %v565_v33 = vmul.f32 %v533_v27, %v341_v26 }
  0xf2   : > { %v343_v30 = vpop.f32.mrf.mxu0  ;;  %732 = vmatmul.mubr.f32.vlgmr.msra.gmra.mxu0 %v563_v25 }
  0xf3   : > { %v566_v32 = vmul.f32 %v534_v24, %v343_v30  ;;  %v429_v24 = vpop.permute.xlu1 %428  ;;  %v549_v30 = vunpack.c.h.bf16 %v496_v14 }
  0xf4   : > { %v347_v34 = vpop.f32.mrf.mxu0 }
  0xf5   : > { %903 = vmatprep.mubr.msk.f32.mxu0 %vm473_vm2, %v566_v32  ;;  %v567_v40 = vmul.f32 %v535_v36, %v347_v34  ;;  %v551_v36 = vunpack.c.l.bf16 %v499_v7 }
  0xf6   : > { %v349_v37 = vpop.f32.mrf.mxu0  ;;  %737 = vmatmul.mubr.f32.gmra.mxu0 %v565_v33 }
  0xf7   : > { %v568_v39 = vmul.f32 %v536_v35, %v349_v37  ;;  %v447_v34 = vpop.permute.xlu1 %446  ;;  %v552_v37 = vunpack.c.l.bf16 %v523_v29 }
  0xf8   : > { %v351_v41 = vpop.f32.mrf.mxu0 }
  0xf9   : > { %904 = vmatprep.mubr.msk.f32.mxu1 %vm473_vm2, %v568_v39  ;;  %v569_v48 = vmul.f32 %v537_v45, %v351_v41  ;;  %v554_v41 = vunpack.c.h.bf16 %v523_v29  ;;  %v502_v45 = vsel %vm482_vm1, %v429_v24, %v445_v10 }
  0xfa   : > { %v353_v46 = vpop.f32.mrf.mxu0  ;;  %742 = vmatmul.mubr.f32.vlgmr.msra.gmra.mxu1 %v567_v40  ;;  %v557_v57 = vunpack.c.h.bf16 %v502_v45 }
  0xfb   : > { %v570_v47 = vmul.f32 %v538_v43, %v353_v46  ;;  %v463_v42 = vpop.permute.xlu1 %462  ;;  %v553_v43 = vunpack.c.h.bf16 %v499_v7 }
  0xfc   : > { %v357_v49 = vpop.f32.mrf.mxu0 }
  0xfd   : > { %905 = vmatprep.mubr.msk.f32.mxu1 %vm473_vm2, %v570_v47  ;;  %v571_v55 = vmul.f32 %v539_v50, %v357_v49  ;;  %v556_v49 = vunpack.c.l.bf16 %v526_v8  ;;  %v555_v50 = vunpack.c.l.bf16 %v502_v45 }
  0xfe   : > { %v359_v53 = vpop.f32.mrf.mxu0  ;;  %747 = vmatmul.mubr.f32.gmra.mxu1 %v569_v48 }
  0xff   : > { %v572_v54 = vmul.f32 %v540_v52, %v359_v53  ;;  %v431_v53 = vpop.permute.xlu1 %430 }
 0x100   : > { %v361_v56 = vpop.f32.mrf.mxu0  ;;  %v505_v59 = vsel %vm482_vm1, %v431_v53, %v447_v34 }
 0x101   : > { %906 = vmatprep.mubr.msk.f32.mxu1 %vm473_vm2, %v572_v54  ;;  %v573_v0 = vmul.f32 %v541_v60, %v361_v56  ;;  %v529_v56 = vsel %vm464_vm0, %v447_v34, %v463_v42 }
 0x102   : > { %v363_v61 = vpop.f32.mrf.mxu0  ;;  %752 = vmatmul.mubr.f32.gmra.mxu1 %v571_v55 }
 0x103   : > { %v574_v63 = vmul.f32 %v542_v58, %v363_v61 }
 0x104   : > { %v367_v1 = vpop.f32.mrf.mxu0 }
 0x105   : > { %907 = vmatprep.mubr.msk.f32.mxu1 %vm473_vm2, %v574_v63  ;;  %v575_v12 = vmul.f32 %v543_v2, %v367_v1  ;;  %v560_v63 = vunpack.c.l.bf16 %v529_v56 }
 0x106   : > { %v369_v4 = vpop.f32.mrf.mxu0  ;;  %757 = vmatmul.mubr.f32.gmra.mxu1 %v573_v0  ;;  %v559_v0 = vunpack.c.l.bf16 %v505_v59 }
 0x107   : > { %v576_v6 = vmul.f32 %v544_v3, %v369_v4 }
 0x108   : > { %v371_v13 = vpop.f32.mrf.mxu0 }
 0x109   : > { %908 = vmatprep.mubr.msk.f32.mxu1 %vm473_vm2, %v576_v6  ;;  %v577_v19 = vmul.f32 %v545_v16, %v371_v13  ;;  %v562_v6 = vunpack.c.h.bf16 %v529_v56 }
 0x10a   : > { %v373_v17 = vpop.f32.mrf.mxu0  ;;  %762 = vmatmul.mubr.f32.gmra.mxu1 %v575_v12  ;;  %v561_v12 = vunpack.c.h.bf16 %v505_v59 }
 0x10b   : > { %v578_v18 = vmul.f32 %v546_v5, %v373_v17 }
 0x10c   : > { %v377_v20 = vpop.f32.mrf.mxu0 }
 0x10d   : > { %909 = vmatprep.mubr.msk.f32.mxu1 %vm473_vm2, %v578_v18  ;;  %v579_v26 = vmul.f32 %v547_v21, %v377_v20 }
 0x10e   : > { %v379_v23 = vpop.f32.mrf.mxu0  ;;  %767 = vmatmul.mubr.f32.gmra.mxu1 %v577_v19 }
 0x10f   : > { %v580_v25 = vmul.f32 %v548_v22, %v379_v23 }
 0x110   : > { %v381_v27 = vpop.f32.mrf.mxu0 }
 0x111   : > { %910 = vmatprep.mubr.msk.f32.mxu1 %vm473_vm2, %v580_v25  ;;  %v581_v33 = vmul.f32 %v549_v30, %v381_v27 }
 0x112   : > { %v383_v31 = vpop.f32.mrf.mxu0  ;;  %772 = vmatmul.mubr.f32.gmra.mxu1 %v579_v26 }
 0x113   : > { %v582_v32 = vmul.f32 %v550_v28, %v383_v31 }
 0x114   : > { %v387_v35 = vpop.f32.mrf.mxu0 }
 0x115   : > { %911 = vmatprep.mubr.msk.f32.mxu1 %vm473_vm2, %v582_v32  ;;  %v583_v39 = vmul.f32 %v551_v36, %v387_v35 }
 0x116   : > { %v389_v38 = vpop.f32.mrf.mxu0  ;;  %777 = vmatmul.mubr.f32.gmra.mxu1 %v581_v33 }
 0x117   : > { %v584_v9 = vmul.f32 %v552_v37, %v389_v38 }
 0x118   : > { %v391_v40 = vpop.f32.mrf.mxu0 }
 0x119   : > { %912 = vmatprep.mubr.msk.f32.mxu1 %vm473_vm2, %v584_v9  ;;  %v585_v47 = vmul.f32 %v553_v43, %v391_v40 }
 0x11a   : > { %v393_v44 = vpop.f32.mrf.mxu0  ;;  %782 = vmatmul.mubr.f32.gmra.mxu1 %v583_v39 }
 0x11b   : > { %v586_v46 = vmul.f32 %v554_v41, %v393_v44 }
 0x11c   : > { %v397_v48 = vpop.f32.mrf.mxu0 }
 0x11d   : > { %913 = vmatprep.mubr.msk.f32.mxu1 %vm473_vm2, %v586_v46  ;;  %v587_v54 = vmul.f32 %v555_v50, %v397_v48 }
 0x11e   : > { %v399_v51 = vpop.f32.mrf.mxu0  ;;  %787 = vmatmul.mubr.f32.gmra.mxu1 %v585_v47 }
 0x11f   : > { %v588_v52 = vmul.f32 %v556_v49, %v399_v51 }
 0x120   : > { %v401_v55 = vpop.f32.mrf.mxu0 }
 0x121   : > { %914 = vmatprep.mubr.msk.f32.mxu1 %vm473_vm2, %v588_v52  ;;  %v589_v61 = vmul.f32 %v557_v57, %v401_v55 }
 0x122   : > { %v403_v58 = vpop.f32.mrf.mxu0  ;;  %792 = vmatmul.mubr.f32.gmra.mxu1 %v587_v54 }
 0x123   : > { %v590_v60 = vmul.f32 %v558_v11, %v403_v58 }
 0x124   : > { %v407_v62 = vpop.f32.mrf.mxu0 }
 0x125   : > { %915 = vmatprep.mubr.msk.f32.mxu1 %vm473_vm2, %v590_v60  ;;  %v591_v3 = vmul.f32 %v559_v0, %v407_v62 }
 0x126   : > { %v409_v1 = vpop.f32.mrf.mxu0  ;;  %797 = vmatmul.mubr.f32.gmra.mxu1 %v589_v61 }
 0x127   : > { %v592_v2 = vmul.f32 %v560_v63, %v409_v1 }
 0x128   : > { %v411_v4 = vpop.f32.mrf.mxu0 }
 0x129   : > { %916 = vmatprep.mubr.msk.f32.mxu1 %vm473_vm2, %v592_v2  ;;  %v593_v14 = vmul.f32 %v561_v12, %v411_v4 }
 0x12a   : > { %v413_v13 = vpop.f32.mrf.mxu0  ;;  %802 = vmatmul.mubr.f32.gmra.mxu1 %v591_v3 }
 0x12b   : > { %v594_v10 = vmul.f32 %v562_v6, %v413_v13 }
 0x12d   : > { %917 = vmatprep.mubr.msk.f32.mxu1 %vm473_vm2, %v594_v10 }
 0x12e   : > { %807 = vmatmul.mubr.f32.gmra.mxu1 %v593_v14 }
 0x1b2   : > { %v733_v5 = vpop.f32.mrf.mxu0 }
 0x1b3   : > { %813 = vst.msk [vmem:[%s1398_s6] sm:$0xff] %vm812_vm3, %v733_v5 }
 0x1b4   : > { %v735_v15 = vpop.f32.mrf.mxu0 }
 0x1b6   : > { %v738_v16 = vpop.f32.mrf.mxu0 }
 0x1b7   : > { %814 = vst.msk [vmem:[%s1398_s6 + $0x8] sm:$0xff] %vm812_vm3, %v738_v16 }
 0x1b8   : > { %v740_v17 = vpop.f32.mrf.mxu0 }
 0x1ba   : > { %v743_v18 = vpop.f32.mrf.mxu1 }
 0x1bb   : > { %815 = vst.msk [vmem:[%s1398_s6 + $0x10] sm:$0xff] %vm812_vm3, %v743_v18 }
 0x1bc   : > { %v745_v19 = vpop.f32.mrf.mxu1 }
 0x1be   : > { %v748_v20 = vpop.f32.mrf.mxu1 }
 0x1bf   : > { %816 = vst.msk [vmem:[%s1398_s6 + $0x18] sm:$0xff] %vm812_vm3, %v748_v20 }
 0x1c0   : > { %v750_v21 = vpop.f32.mrf.mxu1 }
 0x1c2   : > { %v753_v22 = vpop.f32.mrf.mxu1 }
 0x1c3   : > { %817 = vst.msk [vmem:[%s1398_s6 + $0x20] sm:$0xff] %vm812_vm3, %v753_v22 }
 0x1c4   : > { %v755_v23 = vpop.f32.mrf.mxu1 }
 0x1c6   : > { %v758_v24 = vpop.f32.mrf.mxu1 }
 0x1c7   : > { %818 = vst.msk [vmem:[%s1398_s6 + $0x28] sm:$0xff] %vm812_vm3, %v758_v24 }
 0x1c8   : > { %v760_v25 = vpop.f32.mrf.mxu1 }
 0x1ca   : > { %v763_v26 = vpop.f32.mrf.mxu1 }
 0x1cb   : > { %819 = vst.msk [vmem:[%s1398_s6 + $0x30] sm:$0xff] %vm812_vm3, %v763_v26 }
 0x1cc   : > { %v765_v27 = vpop.f32.mrf.mxu1 }
 0x1ce   : > { %v768_v7 = vpop.f32.mrf.mxu1 }
 0x1cf   : > { %820 = vst.msk [vmem:[%s1398_s6 + $0x38] sm:$0xff] %vm812_vm3, %v768_v7 }
 0x1d0   : > { %v770_v28 = vpop.f32.mrf.mxu1 }
 0x1d2   : > { %v773_v29 = vpop.f32.mrf.mxu1 }
 0x1d3   : > { %821 = vst.msk [vmem:[%s1398_s6 + $0x40] sm:$0xff] %vm812_vm3, %v773_v29 }
 0x1d4   : > { %v775_v30 = vpop.f32.mrf.mxu1 }
 0x1d6   : > { %v778_v31 = vpop.f32.mrf.mxu1 }
 0x1d7   : > { %822 = vst.msk [vmem:[%s1398_s6 + $0x48] sm:$0xff] %vm812_vm3, %v778_v31 }
 0x1d8   : > { %v780_v32 = vpop.f32.mrf.mxu1 }
 0x1da   : > { %v783_v33 = vpop.f32.mrf.mxu1 }
 0x1db   : > { %823 = vst.msk [vmem:[%s1398_s6 + $0x50] sm:$0xff] %vm812_vm3, %v783_v33 }
 0x1dc   : > { %v785_v34 = vpop.f32.mrf.mxu1 }
 0x1de   : > { %v788_v35 = vpop.f32.mrf.mxu1 }
 0x1df   : > { %824 = vst.msk [vmem:[%s1398_s6 + $0x58] sm:$0xff] %vm812_vm3, %v788_v35 }
 0x1e0   : > { %v790_v36 = vpop.f32.mrf.mxu1 }
 0x1e2   : > { %v793_v37 = vpop.f32.mrf.mxu1 }
 0x1e3   : > { %825 = vst.msk [vmem:[%s1398_s6 + $0x60] sm:$0xff] %vm812_vm3, %v793_v37 }
 0x1e4   : > { %v795_v38 = vpop.f32.mrf.mxu1 }
 0x1e6   : > { %v798_v9 = vpop.f32.mrf.mxu1 }
 0x1e7   : > { %826 = vst.msk [vmem:[%s1398_s6 + $0x68] sm:$0xff] %vm812_vm3, %v798_v9 }
 0x1e8   : > { %v800_v39 = vpop.f32.mrf.mxu1 }
 0x1ea   : > { %v803_v40 = vpop.f32.mrf.mxu1 }
 0x1eb   : > { %827 = vst.msk [vmem:[%s1398_s6 + $0x70] sm:$0xff] %vm812_vm3, %v803_v40 }
 0x1ec   : > { %v805_v41 = vpop.f32.mrf.mxu1 }
 0x1ee   : > { %v808_v8 = vpop.f32.mrf.mxu1 }
 0x1ef   : > { %828 = vst.msk [vmem:[%s1398_s6 + $0x78] sm:$0xff] %vm812_vm3, %v808_v8 }
 0x1f0   : > { %v810_v42 = vpop.f32.mrf.mxu1 }
 0x1f1 PF: > { %s13_s12 = sadd.s32 1, %s995_s12  }
 0x1f2   : > { %p10_p4 = scmp.ge.s32.totalorder %s13_s12, 4  }
 0x1f4   :  { %12 = sbr.rel (!%p10_p4) target bundleno = 1 (0x1), region = 62 }

</bundles_post_ra>
